<compile_context>
chip_gen: v7x
topology: tpu7x:2x2x1
jax: 0.10.0
libtpu: 0.0.40
codegen_flags: <defaults>
</compile_context>

<pallas_src>
import math

import jax
import jax.numpy as jnp
from jax.experimental import pallas as pl
from jax.experimental.pallas import tpu as pltpu


def temporal_attention_kernel(q_ref, pos_ref, mask_ref, wqkv_ref, bqkv_ref,
                              wo_ref, bo_ref, attn_out_ref, probs_ref):
    Bb, S, D = q_ref.shape

    # positional embedding add (PositionalEmbedding.forward), broadcast over batch
    x = q_ref[...] + pos_ref[...][None, :, :]                         # (Bb, S, D)

    # fused Q/K/V projection: ONE (Bb*S, D) x (D, 3D) MXU matmul for the block
    x2 = x.reshape(Bb * S, D)
    qkv = jnp.dot(x2, wqkv_ref[...],
                  preferred_element_type=jnp.float32) + bqkv_ref[...]  # (Bb*S, 3D)
    q1 = qkv[:, 0 * D:1 * D].reshape(Bb, S, D)    # 1/sqrt(D) pre-folded into wq/bq
    k1 = qkv[:, 1 * D:2 * D].reshape(Bb, S, D)
    v1 = qkv[:, 2 * D:3 * D].reshape(Bb, S, D)

    # causal attention scores (scale already folded into q1)
    scores = jnp.einsum('bqd,bkd->bqk', q1, k1,
                        preferred_element_type=jnp.float32)            # (Bb, S, S)

    # softmax along last dim; 0/1 causal mask applied after exp (no -inf math,
    # diagonal always unmasked so the denominator never vanishes)
    m = jnp.max(scores, axis=-1, keepdims=True)
    e = jnp.exp(scores - m) * mask_ref[...][None, :, :]
    probs = e * pl.reciprocal(jnp.sum(e, axis=-1, keepdims=True))      # exact
    probs_ref[...] = probs

    # output = probs @ V  -> (Bb, S, D)
    out = jnp.einsum('bqk,bkd->bqd', probs, v1,
                     preferred_element_type=jnp.float32)

    # W_o1: Linear(S, 1) == weighted reduction over the seq axis (VPU + XLU)
    attn_out_ref[...] = (jnp.sum(out * wo_ref[...][None, :, :], axis=1)
                         + bo_ref[0, 0])                               # (Bb, D)


def fuse_qkv_params(wq, bq, wk, bk, wv, bv):
    """Concatenate Q/K/V projections and fold 1/sqrt(d_model) into the Q slice."""
    D = wq.shape[0]
    inv_sqrt_d = 1.0 / math.sqrt(D)
    wqkv = jnp.concatenate([wq * inv_sqrt_d, wk, wv], axis=1)   # (D, 3D)
    bqkv = jnp.concatenate([bq * inv_sqrt_d, bk, bv], axis=1)   # (1, 3D)
    return wqkv, bqkv


def temporal_attention_batched(q_batch, pos_emb, wqkv, bqkv, wo_col, bo,
                               *, num_blocks=None):
    """Batched entry: one grid step per batch block; shared params VMEM-resident.

    `wqkv`/`bqkv` must come from `fuse_qkv_params` (Q slice pre-scaled).
    """
    B, S, D = q_batch.shape
    if num_blocks is None:
        # Two parallel steps (one per v7x TensorCore) only when the half-batch
        # block still satisfies the 8-sublane constraint; otherwise a single
        # step (v5e/v6e have one TC, so extra steps are pure overhead).
        num_blocks = 2 if (B % 2 == 0 and (B // 2) % 8 == 0) else 1
    assert B % num_blocks == 0
    Bb = B // num_blocks
    assert Bb == B or Bb % 8 == 0, "batch block must be the full batch or a multiple of 8"

    mask01 = jnp.tril(jnp.ones((S, S), jnp.float32))   # 0/1 causal mask, hoisted

    attn_out, probs = pl.pallas_call(
        temporal_attention_kernel,
        out_shape=(
            jax.ShapeDtypeStruct((B, D), jnp.float32),       # attn_output per sequence
            jax.ShapeDtypeStruct((B, S, S), jnp.float32),    # attn_probs per sequence
        ),
        grid=(num_blocks,),
        in_specs=[
            pl.BlockSpec((Bb, S, D), lambda b: (b, 0, 0)),        # q batch block
            pl.BlockSpec((S, D), lambda b: (0, 0)),               # pos table (shared)
            pl.BlockSpec((S, S), lambda b: (0, 0)),               # causal 0/1 mask (shared)
            pl.BlockSpec((D, 3 * D), lambda b: (0, 0)),           # fused QKV weight
            pl.BlockSpec((1, 3 * D), lambda b: (0, 0)),           # fused QKV bias
            pl.BlockSpec((S, 1), lambda b: (0, 0)),               # W_o1 weight (column)
            pl.BlockSpec(memory_space=pltpu.MemorySpace.SMEM),    # bo scalar
        ],
        out_specs=(
            pl.BlockSpec((Bb, D), lambda b: (b, 0)),
            pl.BlockSpec((Bb, S, S), lambda b: (b, 0, 0)),
        ),
        compiler_params=pltpu.CompilerParams(
            dimension_semantics=("parallel",)),
    )(q_batch, pos_emb, mask01, wqkv, bqkv, wo_col, bo)
    return attn_out, probs      # (B, D), (B, S, S)


def temporal_attention(q, pos_emb, wq, bq, wk, bk, wv, bv, wo, bo):
    """Single-sequence entry point matching the PyTorch module's forward."""
    wqkv, bqkv = fuse_qkv_params(wq, bq, wk, bk, wv, bv)
    wo_col = wo.T                                    # (S, 1)
    attn_out, probs = temporal_attention_batched(q[None], pos_emb, wqkv, bqkv,
                                                 wo_col, bo)
    return attn_out[0], probs[0]   # (D,), (S, S) -- matches the PyTorch .squeeze()s


def reference(q, pos_emb, wq, bq, wk, bk, wv, bv, wo, bo):
    """Pure-JAX reference mirroring the PyTorch forward."""
    S, D = q.shape
    x = q + pos_emb
    q1 = x @ wq + bq
    k1 = x @ wk + bk
    v1 = x @ wv + bv
    mask = jnp.where(jnp.tril(jnp.ones((S, S))) == 1, 0.0, -jnp.inf)
    scores = (q1 @ k1.T + mask) / math.sqrt(D)
    probs = jax.nn.softmax(scores, axis=-1)
    out = probs @ v1                      # (S, D)
    attn_out = (wo @ out + bo)[0]         # (D,)
    return attn_out, probs


if __name__ == "__main__":
    S, D = 8, 32  # seq_length, d_model

    key = jax.random.PRNGKey(0)
    ks = jax.random.split(key, 12)
    scale = 1.0 / math.sqrt(D)

    # single sequence, as in the PyTorch module (no batch dim)
    q = jax.random.normal(ks[0], (S, D), jnp.float32)

    # nn.Embedding(seq_length, d_model) table -- positions are arange(S), so the
    # gathered embedding is just the full table.
    pos_emb = jax.random.normal(ks[1], (S, D), jnp.float32) * 0.1

    # Linear(d_model, d_model) weights, stored pre-transposed as (in, out)
    wq = jax.random.normal(ks[2], (D, D), jnp.float32) * scale
    bq = jax.random.normal(ks[3], (1, D), jnp.float32) * scale
    wk = jax.random.normal(ks[4], (D, D), jnp.float32) * scale
    bk = jax.random.normal(ks[5], (1, D), jnp.float32) * scale
    wv = jax.random.normal(ks[6], (D, D), jnp.float32) * scale
    bv = jax.random.normal(ks[7], (1, D), jnp.float32) * scale

    # Linear(seq_length, 1): weight (1, S), bias (1, 1)
    wo = jax.random.normal(ks[8], (1, S), jnp.float32) * (1.0 / math.sqrt(S))
    bo = jax.random.normal(ks[9], (1, 1), jnp.float32) * (1.0 / math.sqrt(S))

    # --- single-sequence path (module-exact semantics) ---
    attn_out, probs = temporal_attention(q, pos_emb, wq, bq, wk, bk, wv, bv, wo, bo)
    jax.block_until_ready((attn_out, probs))
    ref_out, ref_probs = reference(q, pos_emb, wq, bq, wk, bk, wv, bv, wo, bo)
    assert attn_out.shape == (D,) and probs.shape == (S, S)
    assert jnp.allclose(attn_out, ref_out, atol=1e-4, rtol=1e-4)
    assert jnp.allclose(probs, ref_probs, atol=1e-5, rtol=1e-4)

    # --- batched paths (collapsed grid; shared params stay VMEM-resident) ---
    wqkv, bqkv = fuse_qkv_params(wq, bq, wk, bk, wv, bv)
    vref = jax.vmap(lambda qq: reference(qq, pos_emb, wq, bq, wk, bk, wv, bv, wo, bo))

    # B=8: single grid step (one batch block)
    B1 = 8
    q_b1 = jax.random.normal(ks[10], (B1, S, D), jnp.float32)
    out_b1, probs_b1 = temporal_attention_batched(q_b1, pos_emb, wqkv, bqkv, wo.T, bo)
    jax.block_until_ready((out_b1, probs_b1))
    ref_out_b1, ref_probs_b1 = vref(q_b1)
    assert out_b1.shape == (B1, D) and probs_b1.shape == (B1, S, S)
    assert jnp.allclose(out_b1, ref_out_b1, atol=1e-4, rtol=1e-4)
    assert jnp.allclose(probs_b1, ref_probs_b1, atol=1e-5, rtol=1e-4)

    # B=16: two parallel grid steps (one per v7x TensorCore; harmless on v5e/v6e)
    B2 = 16
    q_b2 = jax.random.normal(ks[11], (B2, S, D), jnp.float32)
    out_b2, probs_b2 = temporal_attention_batched(q_b2, pos_emb, wqkv, bqkv, wo.T, bo)
    jax.block_until_ready((out_b2, probs_b2))
    ref_out_b2, ref_probs_b2 = vref(q_b2)
    assert out_b2.shape == (B2, D) and probs_b2.shape == (B2, S, S)
    assert jnp.allclose(out_b2, ref_out_b2, atol=1e-4, rtol=1e-4)
    assert jnp.allclose(probs_b2, ref_probs_b2, atol=1e-5, rtol=1e-4)

    print("KERNEL_OK")
</pallas_src>

<mosaic_0001>
module attributes {stable_mosaic.version = 11 : i64} {
  func.func @temporal_attention_kernel(%arg0: i32, %arg1: memref<1x8x32xf32, #tpu.memory_space<vmem>>, %arg2: memref<8x32xf32, #tpu.memory_space<vmem>>, %arg3: memref<8x8xf32, #tpu.memory_space<vmem>>, %arg4: memref<32x96xf32, #tpu.memory_space<vmem>>, %arg5: memref<1x96xf32, #tpu.memory_space<vmem>>, %arg6: memref<8x1xf32, #tpu.memory_space<vmem>>, %arg7: memref<1x1xf32, #tpu.memory_space<smem>>, %arg8: memref<1x32xf32, #tpu.memory_space<vmem>>, %arg9: memref<1x8x8xf32, #tpu.memory_space<vmem>>) attributes {dimension_semantics = [#tpu.dimension_semantics<parallel>], iteration_bounds = array<i64: 1>, scalar_prefetch = 0 : i64, scratch_operands = 0 : i64, tpu.core_type = #tpu.core_type<tc>, window_params = [{transform_indices = @transform_0, window_bounds = array<i64: 1, 8, 32>}, {pipeline_mode = #tpu.pipeline_mode<synchronous>, transform_indices = @transform_1, window_bounds = array<i64: 8, 32>}, {pipeline_mode = #tpu.pipeline_mode<synchronous>, transform_indices = @transform_2, window_bounds = array<i64: 8, 8>}, {pipeline_mode = #tpu.pipeline_mode<synchronous>, transform_indices = @transform_3, window_bounds = array<i64: 32, 96>}, {pipeline_mode = #tpu.pipeline_mode<synchronous>, transform_indices = @transform_4, window_bounds = array<i64: 1, 96>}, {pipeline_mode = #tpu.pipeline_mode<synchronous>, transform_indices = @transform_5, window_bounds = array<i64: 8, 1>}, {transform_indices = @transform_6, window_bounds = array<i64: 1, 1>}, {transform_indices = @transform_7, window_bounds = array<i64: 1, 32>}, {transform_indices = @transform_8, window_bounds = array<i64: 1, 8, 8>}]} {
    %c0 = arith.constant 0 : index
    %c0_0 = arith.constant 0 : index
    %c0_1 = arith.constant 0 : index
    %0 = vector.load %arg1[%c0, %c0_0, %c0_1] : memref<1x8x32xf32, #tpu.memory_space<vmem>>, vector<1x8x32xf32>
    %c0_2 = arith.constant 0 : index
    %c0_3 = arith.constant 0 : index
    %1 = vector.load %arg2[%c0_2, %c0_3] : memref<8x32xf32, #tpu.memory_space<vmem>>, vector<8x32xf32>
    %2 = vector.shape_cast %1 : vector<8x32xf32> to vector<1x8x32xf32>
    %3 = arith.addf %0, %2 : vector<1x8x32xf32>
    %4 = vector.shape_cast %3 : vector<1x8x32xf32> to vector<8x32xf32>
    %c0_4 = arith.constant 0 : index
    %c0_5 = arith.constant 0 : index
    %5 = vector.load %arg4[%c0_4, %c0_5] : memref<32x96xf32, #tpu.memory_space<vmem>>, vector<32x96xf32>
    %cst = arith.constant dense<0.000000e+00> : vector<8x96xf32>
    %6 = tpu.matmul %4, %5, %cst {dimension_numbers = #tpu.dot_dimension_numbers<[1], [0], [0], [1], [0, 0, 1, 1], [], []>} : vector<8x32xf32>, vector<32x96xf32>, vector<8x96xf32> -> vector<8x96xf32>
    %c0_6 = arith.constant 0 : index
    %c0_7 = arith.constant 0 : index
    %7 = vector.load %arg5[%c0_6, %c0_7] : memref<1x96xf32, #tpu.memory_space<vmem>>, vector<1x96xf32>
    %8 = vector.broadcast %7 : vector<1x96xf32> to vector<8x96xf32>
    %9 = arith.addf %6, %8 : vector<8x96xf32>
    %10 = vector.extract_strided_slice %9 {offsets = [0, 0], sizes = [8, 32], strides = [1, 1]} : vector<8x96xf32> to vector<8x32xf32>
    %11 = vector.shape_cast %10 : vector<8x32xf32> to vector<1x8x32xf32>
    %12 = vector.extract_strided_slice %9 {offsets = [0, 32], sizes = [8, 32], strides = [1, 1]} : vector<8x96xf32> to vector<8x32xf32>
    %13 = vector.shape_cast %12 : vector<8x32xf32> to vector<1x8x32xf32>
    %14 = vector.extract_strided_slice %9 {offsets = [0, 64], sizes = [8, 32], strides = [1, 1]} : vector<8x96xf32> to vector<8x32xf32>
    %15 = vector.shape_cast %14 : vector<8x32xf32> to vector<1x8x32xf32>
    "tpu.trace_start"() <{level = 10 : i32, message = "bqd,bkd->bqk"}> : () -> ()
    %cst_8 = arith.constant dense<0.000000e+00> : vector<1x8x8xf32>
    %16 = tpu.matmul %11, %13, %cst_8 {dimension_numbers = #tpu.dot_dimension_numbers<[2], [2], [1], [1], [0, 0, 0, 1, 1, 1], [0], [0]>} : vector<1x8x32xf32>, vector<1x8x32xf32>, vector<1x8x8xf32> -> vector<1x8x8xf32>
    "tpu.trace_stop"() : () -> ()
    %cst_9 = arith.constant dense<0xFF800000> : vector<1x8xf32>
    %17 = vector.multi_reduction <maximumf>, %16, %cst_9 [2] : vector<1x8x8xf32> to vector<1x8xf32>
    %18 = vector.shape_cast %17 : vector<1x8xf32> to vector<1x8x1xf32>
    %19 = vector.broadcast %18 : vector<1x8x1xf32> to vector<1x8x8xf32>
    %20 = arith.subf %16, %19 : vector<1x8x8xf32>
    %21 = math.exp %20 : vector<1x8x8xf32>
    %c0_10 = arith.constant 0 : index
    %c0_11 = arith.constant 0 : index
    %22 = vector.load %arg3[%c0_10, %c0_11] : memref<8x8xf32, #tpu.memory_space<vmem>>, vector<8x8xf32>
    %23 = vector.shape_cast %22 : vector<8x8xf32> to vector<1x8x8xf32>
    %24 = arith.mulf %21, %23 : vector<1x8x8xf32>
    %cst_12 = arith.constant dense<0.000000e+00> : vector<1x8xf32>
    %25 = vector.multi_reduction <add>, %24, %cst_12 [2] : vector<1x8x8xf32> to vector<1x8xf32>
    %26 = vector.shape_cast %25 : vector<1x8xf32> to vector<1x8x1xf32>
    %27 = tpu.reciprocal %26 : vector<1x8x1xf32> -> vector<1x8x1xf32>
    %28 = vector.broadcast %27 : vector<1x8x1xf32> to vector<1x8x8xf32>
    %29 = arith.mulf %24, %28 : vector<1x8x8xf32>
    %c0_13 = arith.constant 0 : index
    %c0_14 = arith.constant 0 : index
    %c0_15 = arith.constant 0 : index
    %30 = vector.load %arg9[%c0_13, %c0_14, %c0_15] : memref<1x8x8xf32, #tpu.memory_space<vmem>>, vector<1x8x8xf32>
    tpu.vector_store %arg9[%c0_13, %c0_14, %c0_15], %29 {strides = array<i32>} : memref<1x8x8xf32, #tpu.memory_space<vmem>>, vector<1x8x8xf32>,
    "tpu.trace_start"() <{level = 10 : i32, message = "bqk,bkd->bqd"}> : () -> ()
    %cst_16 = arith.constant dense<0.000000e+00> : vector<1x8x32xf32>
    %31 = tpu.matmul %29, %15, %cst_16 {dimension_numbers = #tpu.dot_dimension_numbers<[2], [1], [1], [2], [0, 0, 0, 1, 1, 2], [0], [0]>} : vector<1x8x8xf32>, vector<1x8x32xf32>, vector<1x8x32xf32> -> vector<1x8x32xf32>
    "tpu.trace_stop"() : () -> ()
    %c0_17 = arith.constant 0 : index
    %c0_18 = arith.constant 0 : index
    %32 = vector.load %arg6[%c0_17, %c0_18] : memref<8x1xf32, #tpu.memory_space<vmem>>, vector<8x1xf32>
    %33 = vector.shape_cast %32 : vector<8x1xf32> to vector<1x8x1xf32>
    %34 = vector.broadcast %33 : vector<1x8x1xf32> to vector<1x8x32xf32>
    %35 = arith.mulf %31, %34 : vector<1x8x32xf32>
    %cst_19 = arith.constant dense<0.000000e+00> : vector<1x32xf32>
    %36 = vector.multi_reduction <add>, %35, %cst_19 [1] : vector<1x8x32xf32> to vector<1x32xf32>
    %c0_20 = arith.constant 0 : index
    %c0_21 = arith.constant 0 : index
    %37 = memref.load %arg7[%c0_20, %c0_21] : memref<1x1xf32, #tpu.memory_space<smem>>
    %38 = vector.broadcast %37 : f32 to vector<1x32xf32>
    %39 = arith.addf %36, %38 : vector<1x32xf32>
    %c0_22 = arith.constant 0 : index
    %c0_23 = arith.constant 0 : index
    %40 = vector.load %arg8[%c0_22, %c0_23] : memref<1x32xf32, #tpu.memory_space<vmem>>, vector<1x32xf32>
    tpu.vector_store %arg8[%c0_22, %c0_23], %39 {strides = array<i32>} : memref<1x32xf32, #tpu.memory_space<vmem>>, vector<1x32xf32>,
    return
  }
  func.func @transform_0(%arg0: i32) -> (i32, i32, i32) {
    %c0_i32 = arith.constant 0 : i32
    %c0_i32_0 = arith.constant 0 : i32
    %c0_i32_1 = arith.constant 0 : i32
    return %arg0, %c0_i32, %c0_i32_0 : i32, i32, i32
  }
  func.func @transform_1(%arg0: i32) -> (i32, i32) {
    %c0_i32 = arith.constant 0 : i32
    %c0_i32_0 = arith.constant 0 : i32
    %c0_i32_1 = arith.constant 0 : i32
    return %c0_i32, %c0_i32_0 : i32, i32
  }
  func.func @transform_2(%arg0: i32) -> (i32, i32) {
    %c0_i32 = arith.constant 0 : i32
    %c0_i32_0 = arith.constant 0 : i32
    %c0_i32_1 = arith.constant 0 : i32
    return %c0_i32, %c0_i32_0 : i32, i32
  }
  func.func @transform_3(%arg0: i32) -> (i32, i32) {
    %c0_i32 = arith.constant 0 : i32
    %c0_i32_0 = arith.constant 0 : i32
    %c0_i32_1 = arith.constant 0 : i32
    return %c0_i32, %c0_i32_0 : i32, i32
  }
  func.func @transform_4(%arg0: i32) -> (i32, i32) {
    %c0_i32 = arith.constant 0 : i32
    %c0_i32_0 = arith.constant 0 : i32
    %c0_i32_1 = arith.constant 0 : i32
    return %c0_i32, %c0_i32_0 : i32, i32
  }
  func.func @transform_5(%arg0: i32) -> (i32, i32) {
    %c0_i32 = arith.constant 0 : i32
    %c0_i32_0 = arith.constant 0 : i32
    %c0_i32_1 = arith.constant 0 : i32
    return %c0_i32, %c0_i32_0 : i32, i32
  }
  func.func @transform_6(%arg0: i32) -> (i32, i32) {
    %c0_i32 = arith.constant 0 : i32
    %c0_i32_0 = arith.constant 0 : i32
    %c0_i32_1 = arith.constant 0 : i32
    return %c0_i32, %c0_i32_0 : i32, i32
  }
  func.func @transform_7(%arg0: i32) -> (i32, i32) {
    %c0_i32 = arith.constant 0 : i32
    %c0_i32_0 = arith.constant 0 : i32
    return %arg0, %c0_i32 : i32, i32
  }
  func.func @transform_8(%arg0: i32) -> (i32, i32, i32) {
    %c0_i32 = arith.constant 0 : i32
    %c0_i32_0 = arith.constant 0 : i32
    %c0_i32_1 = arith.constant 0 : i32
    return %arg0, %c0_i32, %c0_i32_0 : i32, i32, i32
  }
}

</mosaic_0001>

<bundles_post_ra>
// kernel: tpu_custom_call.1
= control target key start
LH: loop header
LB: loop body
LE: loop exit
PB: predicated region body
PF: predicated region fallthrough
CT: control target
= control target key end

     0   :  { %15 = vsyncpa [#allocation4], 0  ;;  %s655_s0 = inlined_call_operand.vmem [shape: f32[1,8,32], index: 0, kind: input, shape index: {}]   ;;  %s656_s1 = inlined_call_operand.vmem [shape: f32[8,32], index: 1, kind: input, shape index: {}]   ;;  %s657_s2 = inlined_call_operand.hbm [shape: f32[8,8], index: 2, kind: input, shape index: {}]   ;;  %s658_s3 = inlined_call_operand.hbm [shape: f32[32,96], index: 3, kind: input, shape index: {}]   ;;  %s659_s4 = inlined_call_operand.vmem [shape: f32[1,96], index: 4, kind: input, shape index: {}]   ;;  %s660_s5 = inlined_call_operand.vmem [shape: f32[8,1], index: 5, kind: input, shape index: {}]   ;;  %s661_s6 = inlined_call_operand.<no memory space> [shape: f32[1,1], index: 6, kind: input, shape index: {}]   ;;  %s662_s7 = inlined_call_operand.hbm [shape: f32[1,32], index: 7, kind: output, shape index: {0}]   ;;  %s663_s8 = inlined_call_operand.hbm [shape: f32[1,8,8], index: 8, kind: output, shape index: {1}]  }
   0x1   :  { %16 = vsyncpa [#allocation7], 0 }
   0x2   :  { %17 = vsyncpa [#allocation5], 0 }
   0x3   :  { %18 = vsyncpa [#allocation10], 0  ;;  %s517_s27 = smov [#allocation3]   ;;  %s518_s29 = smov [#allocation6]  }
   0x4   :  { %s29_s28 = sshll.u32 %s517_s27, 4  ;;  %s38_s30 = sshll.u32 %s518_s29, 4  ;;  %s30_s28 = int_to_ptr.vmem [resolvable:$true] %s29_s28  ;;  %s574_s30 = int_to_ptr.vmem [resolvable:$true] %s38_s30 }
   0x5   :  { %s421_s11 = scalar_lea.hbm %s657_s2, 128 }
   0x6   :  { %p422_p0 = scmp.ne.s32.totalorder %s657_s2, %s421_s11  ;;  %p425_p1 = scmp.lt.u32.totalorder %s421_s11, %s657_s2 }
   0x8   :  { %p427_p2 = pnand %p425_p1, %p422_p0 }
   0xa   :  { %430 = shalt.err (!%p427_p2)
}
   0xb   :  { %s431_s16 = scalar_lea.vmem %s30_s28, 128  ;;  %p436_p4 = scmp.lt.s32.totalorder %s30_s28, %s30_s28 }
   0xc   :  { %p432_p3 = scmp.ne.s32.totalorder %s30_s28, %s431_s16  ;;  %p437_p5 = scmp.lt.s32.totalorder %s431_s16, %s431_s16 }
   0xe   :  { %p438_p6 = por %p437_p5, %p436_p4 }
  0x10   :  { %p439_p7 = pnand %p438_p6, %p432_p3 }
  0x12   :  { %442 = shalt.err (!%p439_p7)
}
  0x13   :  { %32 = dma.hbm_to_vmem [thread:$0]  %s657_s2, 128, %s30_s28, [#allocation4]  }
  0x14   :  { %s443_s21 = scalar_lea.hbm %s658_s3, 512 }
  0x15   :  { %p444_p8 = scmp.ne.s32.totalorder %s658_s3, %s443_s21  ;;  %p447_p9 = scmp.lt.u32.totalorder %s443_s21, %s658_s3 }
  0x17   :  { %p449_p10 = pnand %p447_p9, %p444_p8 }
  0x19   :  { %452 = shalt.err (!%p449_p10)
}
  0x1a   :  { %s453_s26 = scalar_lea.vmem %s574_s30, 512  ;;  %p458_p12 = scmp.lt.s32.totalorder %s574_s30, %s574_s30 }
  0x1b   :  { %p454_p11 = scmp.ne.s32.totalorder %s574_s30, %s453_s26  ;;  %p459_p13 = scmp.lt.s32.totalorder %s453_s26, %s453_s26 }
  0x1d   :  { %p460_p0 = por %p459_p13, %p458_p12 }
  0x1f   :  { %p461_p1 = pnand %p460_p0, %p454_p11 }
  0x21   :  { %464 = shalt.err (!%p461_p1)
}
  0x22   :  { %s519_s2 = smov 128   ;;  %s520_s27 = smov 8  }
  0x23   :  { %44 = dma.hbm_to_vmem [thread:$0]  %s658_s3, 512, %s574_s30, [#allocation7], %s519_s2, %s519_s2, %s520_s27  }
  0x24   :  { %509 = dma.done.wait [#allocation4], 128  }
  0x25   :  { %510 = vsyncadd [#allocation4], 4294967168 }
  0x26   :  { %511 = dma.done.wait [#allocation7], 512  }
  0x27   :  { %512 = vsyncadd [#allocation7], 4294966784  ;;  %v521_v0 = vmov 0.0|0.0   ;;  %vm522_vm0 = vmmov 0   ;;  %v523_v1 = vmov 0.0   ;;  %v60_v2 = vld [vmem:[#allocation6] sm:$0xff] }
  0x28   :  { %397 = vmatprep.subr.bf16.mxu0 %v521_v0  ;;  %384 = vmatprep.mubr.msk.f32.mxu0 %vm522_vm0, %v523_v1  ;;  %v61_v3 = vld [vmem:[#allocation6 + $0x8] sm:$0xff]  ;;  %v62_v4 = vld [vmem:[#allocation6 + $0x10] sm:$0xff]  ;;  %v63_v6 = vld [vmem:[#allocation6 + $0x18] sm:$0xff]  ;;  %vm71_vm1 = vcmask 261120   ;;  %s524_s13 = smov 96   ;;  %vm222_vm2 = vcmask 64512  }
  0x29   :  { %387 = vmatprep.subr.mxu1 %v523_v1  ;;  %389 = vmatprep.mubr.msk.f32.mxu1 %vm522_vm0, %v523_v1  ;;  %v398_v5 = vpack.c.bf16 %v61_v3, %v60_v2  ;;  %v401_v7 = vpack.c.bf16 %v63_v6, %v62_v4  ;;  %v57_v8 = vld [vmem:[%s655_s0] sm:$0xff]  ;;  %s525_s0 = smov 64   ;;  %v526_v27 = vmov 0   ;;  %s527_s14 = smov [#allocation9]  }
  0x2a   :  { %v58_v9 = vld [vmem:[%s656_s1] sm:$0xff]  ;;  %415 = vset.pattern.permute.xlu1 %v526_v27  ;;  %416 = vset.pattern.permute.xlu0 %v526_v27  ;;  %s348_s15 = sshll.u32 %s527_s14, 4  ;;  %s349_s15 = int_to_ptr.vmem [resolvable:$true] %s348_s15 }
  0x2b   :  { %399 = vmatpush3.bf16.msra.mxu0 %v398_v5  ;;  %v59_v10 = vadd.f32 %v58_v9, %v57_v8  ;;  %v362_v11 = vld [vmem:[%s659_s4] ss:$0 sm:$0xff]  ;;  %s465_s16 = scalar_lea.vmem %s349_s15, 128  ;;  %p470_p3 = scmp.lt.s32.totalorder %s349_s15, %s349_s15 }
  0x2c   :  { %400 = vmatprep.subr.bf16.mxu0 %v521_v0  ;;  %v229_v22 = vld [vmem:[#allocation3] sm:$0xff]  ;;  %p466_p2 = scmp.ne.s32.totalorder %s349_s15, %s465_s16  ;;  %p471_p4 = scmp.lt.s32.totalorder %s465_s16, %s465_s16 }
  0x2d   :  { %v313_v26 = vld [vmem:[%s660_s5] sm:$0xff] }
  0x2e   :  { %p472_p5 = por %p471_p4, %p470_p3 }
  0x2f   :  { %402 = vmatpush3.bf16.msra.mxu0 %v401_v7 }
  0x30   :  { %p473_p6 = pnand %p472_p5, %p466_p2 }
  0x32   :  { %385 = vmatmul.mubr.msk.f32.vlgmr.msra.gmra.mrb[0].mxu0 %vm71_vm1, %v59_v10 }
 0x105   :  { %v141_v12 = vpop.f32.mrb[0].mxu0 }
 0x106   :  { %v142_v13 = vadd.f32 %v362_v11, %v141_v12  ;;  %v386_v14 = vpop.f32.mrb[1].mxu0 }
 0x108   :  { %146 = vrot.lane.b32.xlu0 %v142_v13, %s524_s13 }
 0x17a   :  { %v147_v15 = vpop.permute.xlu0 %146 }
 0x17b   :  { %388 = vmatpush3.xpose.msk.msra.mxu1 %vm71_vm1, %v147_v15 }
 0x17c   :  { %392 = vmatprep.subr.mxu1 %v523_v1 }
 0x17e   :  { %390 = vmatmul.mubr.msk.f32.vlgmr.msra.gmra.mrb[0].mxu1 %vm71_vm1, %v142_v13 }
 0x17f   :  { %394 = vmatprep.mubr.msk.f32.mxu1 %vm522_vm0, %v523_v1 }
 0x251   :  { %v218_v16 = vpop.f32.mrb[0].mxu1 }
 0x252   :  { %v391_v17 = vpop.f32.mrb[1].mxu1  ;;  %v223_v18 = vsel %vm222_vm2, %v218_v16, -inf }
 0x253   :  { %224 = vmax.xlane.f32.xlu0 %v223_v18 }
 0x2e0   :  { %v225_v19 = vpop.xlane.xlu0 %224 }
 0x2e1   :  { %v226_v20 = vsub.f32 %v218_v16, %v225_v19 }
 0x2e3   :  { %v227_v21 = vmul.f32 1.442695, %v226_v20 }
 0x2e5   :  { %417 = vpow2.f32 %v227_v21 }
 0x2ef   :  { %v418_v23 = vpop.eup %417 }
 0x2f0   :  { %v230_v24 = vmul.f32 %v418_v23, %v229_v22 }
 0x2f2   :  { %v231_v25 = vsel %vm222_vm2, %v230_v24, 0.0 }
 0x2f3   :  { %232 = vadd.xlane.f32.xlu1 %v231_v25 }
 0x304   :  { %237 = vrot.lane.b32.xlu1 %v142_v13, %s525_s0 }
 0x308   :  { %316 = vperm.xlu1 %415, %v313_v26  }
 0x380   :  { %v233_v28 = vpop.xlane.xlu1 %232 }
 0x381   :  { %419 = vrcp.f32 %v233_v28 }
 0x384   :  { %v238_v29 = vpop.permute.xlu1 %237 }
 0x385   :  { %393 = vmatpush3.msra.mxu1 %v238_v29 }
 0x38b   :  { %v420_v30 = vpop.eup %419 }
 0x38c   :  { %v235_v31 = vmul.f32 %v420_v30, %v230_v24 }
 0x38e   :  { %236 = vst.msk [vmem:[#allocation9] sm:$0xff] %vm222_vm2, %v235_v31  ;;  %395 = vmatmul.mubr.msk.f32.vlgmr.msra.gmra.mrb[2].mxu1 %vm222_vm2, %v235_v31 }
 0x38f   :  { %476 = shalt.err (!%p473_p6)
}
 0x390   :  { %s477_s18 = scalar_lea.hbm %s663_s8, 128 }
 0x391   :  { %p478_p7 = scmp.ne.s32.totalorder %s663_s8, %s477_s18  ;;  %p481_p8 = scmp.lt.u32.totalorder %s477_s18, %s663_s8 }
 0x393   :  { %p483_p9 = pnand %p481_p8, %p478_p7 }
 0x395   :  { %486 = shalt.err (!%p483_p9)
}
 0x396   :  { %351 = dma.vmem_to_hbm [thread:$0]  %s349_s15, 128, %s663_s8, [#allocation10]   ;;  %v317_v32 = vpop.permute.xlu1 %316  ;;  %v328_v42 = vstv %s661_s6  ;;  %vm330_vm3 = vcmask 253952  }
 0x397   :  { %s528_s2 = smov [#allocation8]  }
 0x398   :  { %s338_s27 = sshll.u32 %s528_s2, 4  ;;  %s339_s27 = int_to_ptr.vmem [resolvable:$true] %s338_s27 }
 0x399   :  { %s487_s8 = scalar_lea.vmem %s339_s27, 16  ;;  %s491_s28 = scalar_lea.vmem %s339_s27, 32 }
 0x39a   :  { %p488_p10 = scmp.ne.s32.totalorder %s339_s27, %s487_s8  ;;  %p492_p11 = scmp.lt.s32.totalorder %s339_s27, %s339_s27 }
 0x39b   :  { %p493_p12 = scmp.lt.s32.totalorder %s491_s28, %s487_s8 }
 0x39d   :  { %p494_p13 = por %p493_p12, %p492_p11 }
 0x39f   :  { %p495_p0 = pnand %p494_p13, %p488_p10 }
 0x461   :  { %v309_v33 = vpop.f32.mrb[2].mxu1 }
 0x462   :  { %v319_v34 = vmul.f32 %v317_v32, %v309_v33  ;;  %v396_v35 = vpop.f32.mrb[3].mxu1 }
 0x464   :  { %v320_v36 = vsel %vm71_vm1, %v319_v34, 0.0 }
 0x465   :  { %v321_v37 = vrot.slane %v320_v36, 4 }
 0x467   :  { %v322_v38 = vadd.f32 %v321_v37, %v320_v36 }
 0x469   :  { %v323_v39 = vrot.slane %v322_v38, 2 }
 0x46b   :  { %v324_v40 = vadd.f32 %v323_v39, %v322_v38 }
 0x46d   :  { %v325_v41 = vrot.slane %v324_v40, 1 }
 0x46f   :  { %v326_v43 = vadd.f32 %v325_v41, %v324_v40 }
 0x471   :  { %v329_v44 = vadd.f32 %v328_v42, %v326_v43 }
 0x473   :  { %331 = vst.msk [vmem:[#allocation8] sm:$0x1] %vm330_vm3, %v329_v44 }
 0x474   :  { %498 = shalt.err (!%p495_p0)
}
 0x475   :  { %s499_s30 = scalar_lea.hbm %s662_s7, 16 }
 0x476   :  { %p500_p1 = scmp.ne.s32.totalorder %s662_s7, %s499_s30  ;;  %p503_p2 = scmp.lt.u32.totalorder %s499_s30, %s662_s7 }
 0x478   :  { %p505_p3 = pnand %p503_p2, %p500_p1 }
 0x47a   :  { %508 = shalt.err (!%p505_p3)
}
 0x47b   :  { %341 = dma.vmem_to_hbm [thread:$0]  %s339_s27, 16, %s662_s7, [#allocation5]  }
 0x47c   :  { %513 = dma.done.wait [#allocation5], 16  }
 0x47d   :  { %514 = vsyncadd [#allocation5], 4294967280 }
 0x47e   :  { %515 = dma.done.wait [#allocation10], 128  }
 0x47f   :  { %516 = vsyncadd [#allocation10], 4294967168 }
 0x480   :  { %358 = vsyncpa [#allocation4], 1 }
 0x481   :  { %359 = vsyncpa [#allocation7], 1 }
 0x482   :  { %360 = vsyncpa [#allocation5], 1 }
 0x483   :  { %361 = vsyncpa [#allocation10], 1 }

</bundles_post_ra>
